<compile_context>
chip_gen: v7x
topology: tpu7x:2x2x1
jax: 0.10.0
libtpu: 0.0.40
codegen_flags: <defaults>
</compile_context>

<pallas_src>
import math

import jax
import jax.numpy as jnp
from jax.experimental import pallas as pl
from jax.experimental.pallas import tpu as pltpu

_INV_SQRT2 = 1.0 / math.sqrt(2.0)
_LANE = 128
_SUBLANE = 8


def _round_up(x: int, m: int) -> int:
    return ((x + m - 1) // m) * m


def _mlp_kernel(x_ref, w1_ref, b1_ref, w2_ref, b2_ref, o_ref):
    # x_ref : (tm, D_in)      compute dtype (bf16)
    # w1_ref: (D_in, D_hid)   compute dtype, resident across the grid
    # b1_ref: (1, D_hid)      f32
    # w2_ref: (D_hid, D_out)  compute dtype, resident across the grid
    # b2_ref: (1, D_out)      f32
    # o_ref : (tm, D_out)     f32 output
    #
    # fc1 on the MXU with f32 accumulation.
    h = jnp.dot(x_ref[...], w1_ref[...], preferred_element_type=jnp.float32)
    h = h + b1_ref[...]

    # Exact (erf) GELU in f32 — matches torch nn.GELU default; erf rides the EUP.
    h = 0.5 * h * (1.0 + jax.lax.erf(h * _INV_SQRT2))

    # fc2: cast activations to the MXU dtype, accumulate in f32.
    y = jnp.dot(h.astype(w2_ref.dtype), w2_ref[...],
                preferred_element_type=jnp.float32)
    y = y + b2_ref[...]
    o_ref[...] = y.astype(o_ref.dtype)


def mlp_pallas(x, w1, b1, w2, b2, *, tm=256, compute_dtype=jnp.bfloat16):
    """DreamSim ViT Mlp forward.

    x : (B, N, D_in) float32
    w1: (D_in, D_hid)   (torch fc1.weight transposed), b1: (D_hid,)
    w2: (D_hid, D_out)  (torch fc2.weight transposed), b2: (D_out,)
    Returns (B, N, D_out) in x.dtype.
    """
    out_dtype = x.dtype
    B, N, D_in = x.shape
    D_hid = w1.shape[1]
    D_out = w2.shape[1]
    M = B * N

    # Lane-dense padding of feature dims (multiples of 128).
    Dp_in = _round_up(D_in, _LANE)
    Dp_hid = _round_up(D_hid, _LANE)
    Dp_out = _round_up(D_out, _LANE)

    # Token-tile selection: big tiles for real workloads, shrunk for tiny M,
    # always a multiple of the sublane (8).  Token axis padded to the tile.
    tm_eff = _round_up(min(tm, _round_up(M, _SUBLANE)), _SUBLANE)
    Mp = _round_up(M, tm_eff)

    # Wrapper-side zero padding (zeros contribute exactly zero to the matmuls;
    # padded token rows / output columns are sliced off below).
    x2 = jnp.zeros((Mp, Dp_in), compute_dtype).at[:M, :D_in].set(
        x.reshape(M, D_in).astype(compute_dtype))
    w1p = jnp.zeros((Dp_in, Dp_hid), compute_dtype).at[:D_in, :D_hid].set(
        w1.astype(compute_dtype))
    w2p = jnp.zeros((Dp_hid, Dp_out), compute_dtype).at[:D_hid, :D_out].set(
        w2.astype(compute_dtype))
    b1p = jnp.zeros((1, Dp_hid), jnp.float32).at[:, :D_hid].set(
        b1.reshape(1, D_hid).astype(jnp.float32))
    b2p = jnp.zeros((1, Dp_out), jnp.float32).at[:, :D_out].set(
        b2.reshape(1, D_out).astype(jnp.float32))

    grid = (Mp // tm_eff,)

    # Explicit VMEM budget: double-buffered resident weights (bf16) + biases +
    # double-buffered x/out tiles + the f32 fc1 intermediate, plus headroom.
    cs = jnp.dtype(compute_dtype).itemsize
    est = (2 * (Dp_in * Dp_hid + Dp_hid * Dp_out) * cs          # W1, W2
           + 2 * (Dp_hid + Dp_out) * 4                          # b1, b2 (f32)
           + 2 * tm_eff * Dp_in * cs                            # x tile
           + 2 * tm_eff * Dp_out * 4                            # out tile (f32)
           + tm_eff * Dp_hid * 4)                               # fc1 intermediate
    vmem_limit = min(int(1.25 * est) + (8 << 20), 64 << 20)

    out = pl.pallas_call(
        _mlp_kernel,
        out_shape=jax.ShapeDtypeStruct((Mp, Dp_out), out_dtype),
        grid_spec=pltpu.PrefetchScalarGridSpec(
            num_scalar_prefetch=0,
            grid=grid,
            in_specs=[
                pl.BlockSpec((tm_eff, Dp_in), lambda i: (i, 0)),   # x tile
                pl.BlockSpec((Dp_in, Dp_hid), lambda i: (0, 0)),   # W1 (resident)
                pl.BlockSpec((1, Dp_hid), lambda i: (0, 0)),       # b1
                pl.BlockSpec((Dp_hid, Dp_out), lambda i: (0, 0)),  # W2 (resident)
                pl.BlockSpec((1, Dp_out), lambda i: (0, 0)),       # b2
            ],
            out_specs=pl.BlockSpec((tm_eff, Dp_out), lambda i: (i, 0)),
        ),
        compiler_params=pltpu.CompilerParams(
            dimension_semantics=("parallel",),   # megacore sharding on v7x
            vmem_limit_bytes=vmem_limit,
        ),
    )(x2, w1p, b1p, w2p, b2p)

    return out[:M, :D_out].reshape(B, N, D_out)


def mlp_reference(x, w1, b1, w2, b2, compute_dtype=jnp.bfloat16):
    """Matched-precision reference: bf16 matmul operands, f32 accumulation,
    f32 bias + exact erf GELU (same arithmetic as the kernel)."""
    cd = compute_dtype
    h = jnp.dot(x.astype(cd), w1.astype(cd),
                preferred_element_type=jnp.float32) + b1.astype(jnp.float32)
    h = 0.5 * h * (1.0 + jax.lax.erf(h * _INV_SQRT2))
    y = jnp.dot(h.astype(cd), w2.astype(cd),
                preferred_element_type=jnp.float32) + b2.astype(jnp.float32)
    return y.astype(x.dtype)


if __name__ == "__main__":
    # Small shapes consistent with the module: ViT MLP with expansion ratio 4.
    # N=10 deliberately not a multiple of 8 to exercise the token-padding path.
    B, N = 2, 10           # batch, sequence length (tokens)
    D_in = 32              # in_features
    D_hid = 128            # hidden_features = 4 * in_features
    D_out = 32             # out_features = in_features

    key = jax.random.PRNGKey(0)
    kx, k1, kb1, k2, kb2 = jax.random.split(key, 5)

    x = jax.random.normal(kx, (B, N, D_in), dtype=jnp.float32)

    # Deterministic synthetic parameters (stored pre-transposed vs torch
    # nn.Linear: (in, out)).
    w1 = jax.random.normal(k1, (D_in, D_hid), dtype=jnp.float32) / math.sqrt(D_in)
    b1 = jax.random.normal(kb1, (D_hid,), dtype=jnp.float32) * 0.02
    w2 = jax.random.normal(k2, (D_hid, D_out), dtype=jnp.float32) / math.sqrt(D_hid)
    b2 = jax.random.normal(kb2, (D_out,), dtype=jnp.float32) * 0.02

    y = mlp_pallas(x, w1, b1, w2, b2)
    y = jax.block_until_ready(y)

    y_ref = mlp_reference(x, w1, b1, w2, b2)
    assert y.shape == (B, N, D_out)
    assert jnp.allclose(y, y_ref, atol=1e-4, rtol=1e-4), "mismatch vs reference"

    print("KERNEL_OK")
</pallas_src>

<mosaic_0001>
module attributes {stable_mosaic.version = 11 : i64} {
  func.func @_mlp_kernel(%arg0: i32, %arg1: memref<24x128xbf16, #tpu.memory_space<vmem>>, %arg2: memref<128x128xbf16, #tpu.memory_space<vmem>>, %arg3: memref<1x128xf32, #tpu.memory_space<vmem>>, %arg4: memref<128x128xbf16, #tpu.memory_space<vmem>>, %arg5: memref<1x128xf32, #tpu.memory_space<vmem>>, %arg6: memref<24x128xf32, #tpu.memory_space<vmem>>) attributes {dimension_semantics = [#tpu.dimension_semantics<parallel>], iteration_bounds = array<i64: 1>, scalar_prefetch = 0 : i64, scratch_operands = 0 : i64, tpu.core_type = #tpu.core_type<tc>, window_params = [{transform_indices = @transform_0, window_bounds = array<i64: 24, 128>}, {pipeline_mode = #tpu.pipeline_mode<synchronous>, transform_indices = @transform_1, window_bounds = array<i64: 128, 128>}, {pipeline_mode = #tpu.pipeline_mode<synchronous>, transform_indices = @transform_2, window_bounds = array<i64: 1, 128>}, {pipeline_mode = #tpu.pipeline_mode<synchronous>, transform_indices = @transform_3, window_bounds = array<i64: 128, 128>}, {pipeline_mode = #tpu.pipeline_mode<synchronous>, transform_indices = @transform_4, window_bounds = array<i64: 1, 128>}, {transform_indices = @transform_5, window_bounds = array<i64: 24, 128>}]} {
    %c0 = arith.constant 0 : index
    %c0_0 = arith.constant 0 : index
    %0 = vector.load %arg1[%c0, %c0_0] : memref<24x128xbf16, #tpu.memory_space<vmem>>, vector<24x128xbf16>
    %c0_1 = arith.constant 0 : index
    %c0_2 = arith.constant 0 : index
    %1 = vector.load %arg2[%c0_1, %c0_2] : memref<128x128xbf16, #tpu.memory_space<vmem>>, vector<128x128xbf16>
    %cst = arith.constant dense<0.000000e+00> : vector<24x128xf32>
    %2 = tpu.matmul %0, %1, %cst {dimension_numbers = #tpu.dot_dimension_numbers<[1], [0], [0], [1], [0, 0, 1, 1], [], []>} : vector<24x128xbf16>, vector<128x128xbf16>, vector<24x128xf32> -> vector<24x128xf32>
    %c0_3 = arith.constant 0 : index
    %c0_4 = arith.constant 0 : index
    %3 = vector.load %arg3[%c0_3, %c0_4] : memref<1x128xf32, #tpu.memory_space<vmem>>, vector<1x128xf32>
    %4 = vector.broadcast %3 : vector<1x128xf32> to vector<24x128xf32>
    %5 = arith.addf %2, %4 : vector<24x128xf32>
    %cst_5 = arith.constant 5.000000e-01 : f32
    %6 = vector.broadcast %cst_5 : f32 to vector<24x128xf32>
    %7 = arith.mulf %6, %5 : vector<24x128xf32>
    %cst_6 = arith.constant 0.707106769 : f32
    %8 = vector.broadcast %cst_6 : f32 to vector<24x128xf32>
    %9 = arith.mulf %5, %8 : vector<24x128xf32>
    %10 = math.erf %9 : vector<24x128xf32>
    %cst_7 = arith.constant 1.000000e+00 : f32
    %11 = vector.broadcast %cst_7 : f32 to vector<24x128xf32>
    %12 = arith.addf %11, %10 : vector<24x128xf32>
    %13 = arith.mulf %7, %12 : vector<24x128xf32>
    %14 = arith.truncf %13 : vector<24x128xf32> to vector<24x128xbf16>
    %c0_8 = arith.constant 0 : index
    %c0_9 = arith.constant 0 : index
    %15 = vector.load %arg4[%c0_8, %c0_9] : memref<128x128xbf16, #tpu.memory_space<vmem>>, vector<128x128xbf16>
    %cst_10 = arith.constant dense<0.000000e+00> : vector<24x128xf32>
    %16 = tpu.matmul %14, %15, %cst_10 {dimension_numbers = #tpu.dot_dimension_numbers<[1], [0], [0], [1], [0, 0, 1, 1], [], []>} : vector<24x128xbf16>, vector<128x128xbf16>, vector<24x128xf32> -> vector<24x128xf32>
    %c0_11 = arith.constant 0 : index
    %c0_12 = arith.constant 0 : index
    %17 = vector.load %arg5[%c0_11, %c0_12] : memref<1x128xf32, #tpu.memory_space<vmem>>, vector<1x128xf32>
    %18 = vector.broadcast %17 : vector<1x128xf32> to vector<24x128xf32>
    %19 = arith.addf %16, %18 : vector<24x128xf32>
    %c0_13 = arith.constant 0 : index
    %c0_14 = arith.constant 0 : index
    %20 = vector.load %arg6[%c0_13, %c0_14] : memref<24x128xf32, #tpu.memory_space<vmem>>, vector<24x128xf32>
    tpu.vector_store %arg6[%c0_13, %c0_14], %19 {strides = array<i32>} : memref<24x128xf32, #tpu.memory_space<vmem>>, vector<24x128xf32>,
    return
  }
  func.func @transform_0(%arg0: i32) -> (i32, i32) {
    %c0_i32 = arith.constant 0 : i32
    %c0_i32_0 = arith.constant 0 : i32
    return %arg0, %c0_i32 : i32, i32
  }
  func.func @transform_1(%arg0: i32) -> (i32, i32) {
    %c0_i32 = arith.constant 0 : i32
    %c0_i32_0 = arith.constant 0 : i32
    %c0_i32_1 = arith.constant 0 : i32
    return %c0_i32, %c0_i32_0 : i32, i32
  }
  func.func @transform_2(%arg0: i32) -> (i32, i32) {
    %c0_i32 = arith.constant 0 : i32
    %c0_i32_0 = arith.constant 0 : i32
    %c0_i32_1 = arith.constant 0 : i32
    return %c0_i32, %c0_i32_0 : i32, i32
  }
  func.func @transform_3(%arg0: i32) -> (i32, i32) {
    %c0_i32 = arith.constant 0 : i32
    %c0_i32_0 = arith.constant 0 : i32
    %c0_i32_1 = arith.constant 0 : i32
    return %c0_i32, %c0_i32_0 : i32, i32
  }
  func.func @transform_4(%arg0: i32) -> (i32, i32) {
    %c0_i32 = arith.constant 0 : i32
    %c0_i32_0 = arith.constant 0 : i32
    %c0_i32_1 = arith.constant 0 : i32
    return %c0_i32, %c0_i32_0 : i32, i32
  }
  func.func @transform_5(%arg0: i32) -> (i32, i32) {
    %c0_i32 = arith.constant 0 : i32
    %c0_i32_0 = arith.constant 0 : i32
    return %arg0, %c0_i32 : i32, i32
  }
}

</mosaic_0001>

<bundles_post_ra>
// kernel: tpu_custom_call.1
= control target key start
LH: loop header
LB: loop body
LE: loop exit
PB: predicated region body
PF: predicated region fallthrough
CT: control target
= control target key end

     0   :  { %10 = vsyncpa [#allocation3], 0  ;;  %s666_s0 = inlined_call_operand.hbm [shape: bf16[24,128], index: 0, kind: input, shape index: {}]   ;;  %s667_s1 = inlined_call_operand.hbm [shape: bf16[128,128], index: 1, kind: input, shape index: {}]   ;;  %s668_s2 = inlined_call_operand.vmem [shape: f32[1,128], index: 2, kind: input, shape index: {}]   ;;  %s669_s3 = inlined_call_operand.hbm [shape: bf16[128,128], index: 3, kind: input, shape index: {}]   ;;  %s670_s4 = inlined_call_operand.vmem [shape: f32[1,128], index: 4, kind: input, shape index: {}]   ;;  %s671_s5 = inlined_call_operand.hbm [shape: f32[24,128], index: 5, kind: output, shape index: {}]  }
   0x1   :  { %11 = vsyncpa [#allocation6], 0 }
   0x2   :  { %12 = vsyncpa [#allocation4], 0  ;;  %s558_s18 = smov [#allocation5]   ;;  %s559_s20 = smov [#allocation2]  }
   0x3   :  { %s30_s19 = sshll.u32 %s558_s18, 4  ;;  %s18_s21 = sshll.u32 %s559_s20, 4  ;;  %s31_s19 = int_to_ptr.vmem [resolvable:$true] %s30_s19  ;;  %s596_s21 = int_to_ptr.vmem [resolvable:$true] %s18_s21 }
   0x4   :  { %s464_s24 = scalar_lea.hbm %s667_s1, 1024 }
   0x5   :  { %p465_p0 = scmp.ne.s32.totalorder %s667_s1, %s464_s24  ;;  %p468_p1 = scmp.lt.u32.totalorder %s464_s24, %s667_s1 }
   0x7   :  { %p470_p2 = pnand %p468_p1, %p465_p0 }
   0x9   :  { %473 = shalt.err (!%p470_p2)
}
   0xa   :  { %s474_s29 = scalar_lea.vmem %s31_s19, 1024  ;;  %p479_p4 = scmp.lt.s32.totalorder %s31_s19, %s31_s19 }
   0xb   :  { %p475_p3 = scmp.ne.s32.totalorder %s31_s19, %s474_s29  ;;  %p480_p5 = scmp.lt.s32.totalorder %s474_s29, %s474_s29 }
   0xd   :  { %p481_p6 = por %p480_p5, %p479_p4 }
   0xf   :  { %p482_p7 = pnand %p481_p6, %p475_p3 }
  0x11   :  { %485 = shalt.err (!%p482_p7)
}
  0x12   :  { %s560_s30 = smov 64   ;;  %s561_s6 = smov 4  }
  0x13   :  { %36 = dma.hbm_to_vmem [thread:$0]  %s667_s1, 1024, %s31_s19, [#allocation6], %s560_s30, %s560_s30, %s561_s6  }
  0x14   :  { %s486_s11 = scalar_lea.hbm %s666_s0, 192 }
  0x15   :  { %p487_p8 = scmp.ne.s32.totalorder %s666_s0, %s486_s11  ;;  %p490_p9 = scmp.lt.u32.totalorder %s486_s11, %s666_s0 }
  0x17   :  { %p492_p10 = pnand %p490_p9, %p487_p8 }
  0x19   :  { %495 = shalt.err (!%p492_p10)
}
  0x1a   :  { %s496_s16 = scalar_lea.vmem %s596_s21, 192  ;;  %p501_p12 = scmp.lt.s32.totalorder %s596_s21, %s596_s21 }
  0x1b   :  { %p497_p11 = scmp.ne.s32.totalorder %s596_s21, %s496_s16  ;;  %p502_p13 = scmp.lt.s32.totalorder %s496_s16, %s496_s16 }
  0x1d   :  { %p503_p0 = por %p502_p13, %p501_p12 }
  0x1f   :  { %p504_p1 = pnand %p503_p0, %p497_p11 }
  0x21   :  { %507 = shalt.err (!%p504_p1)
}
  0x22   :  { %24 = dma.hbm_to_vmem [thread:$0]  %s666_s0, 192, %s596_s21, [#allocation3], %s560_s30, %s560_s30, %s561_s6  }
  0x23   :  { %s562_s18 = smov [#allocation7]   ;;  %s508_s23 = scalar_lea.hbm %s669_s3, 1024 }
  0x24   :  { %s44_s19 = sshll.u32 %s562_s18, 4  ;;  %p509_p2 = scmp.ne.s32.totalorder %s669_s3, %s508_s23  ;;  %s45_s19 = int_to_ptr.vmem [resolvable:$true] %s44_s19 }
  0x25   :  { %p512_p3 = scmp.lt.u32.totalorder %s508_s23, %s669_s3 }
  0x27   :  { %p514_p4 = pnand %p512_p3, %p509_p2 }
  0x29   :  { %517 = shalt.err (!%p514_p4)
}
  0x2a   :  { %s518_s28 = scalar_lea.vmem %s45_s19, 1024  ;;  %p523_p6 = scmp.lt.s32.totalorder %s45_s19, %s45_s19 }
  0x2b   :  { %p519_p5 = scmp.ne.s32.totalorder %s45_s19, %s518_s28  ;;  %p524_p7 = scmp.lt.s32.totalorder %s518_s28, %s518_s28 }
  0x2d   :  { %p525_p8 = por %p524_p7, %p523_p6 }
  0x2f   :  { %p526_p9 = pnand %p525_p8, %p519_p5 }
  0x31   :  { %529 = shalt.err (!%p526_p9)
}
  0x32   :  { %50 = dma.hbm_to_vmem [thread:$0]  %s669_s3, 1024, %s45_s19, [#allocation6], %s560_s30, %s560_s30, %s561_s6  }
  0x33   :  { %552 = dma.done.wait [#allocation3], 192  }
  0x34   :  { %553 = vsyncadd [#allocation3], 4294967104 }
  0x35   :  { %554 = dma.done.wait [#allocation6], 2048  }
  0x36   :  { %555 = vsyncadd [#allocation6], 4294965248  ;;  %v440_v0 = vld [vmem:[#allocation5] sm:$0xff]   ;;  %v441_v1 = vld [vmem:[#allocation5 + $0x8] sm:$0xff]   ;;  %s563_s6 = smov [#allocation8]  }
  0x37   :  { %392 = vmatprep.subr.bf16.mxu0 %v440_v0  ;;  %v442_v2 = vld [vmem:[#allocation5 + $0x10] sm:$0xff]   ;;  %v443_v3 = vld [vmem:[#allocation5 + $0x18] sm:$0xff]   ;;  %v444_v5 = vld [vmem:[#allocation5 + $0x20] sm:$0xff]   ;;  %s339_s7 = sshll.u32 %s563_s6, 4  ;;  %s340_s7 = int_to_ptr.vmem [resolvable:$true] %s339_s7 }
  0x38   :  { %393 = vmatpush3.bf16.msra.mxu0 %v440_v0  ;;  %v448_v4 = vld [vmem:[#allocation2] sm:$0xff]   ;;  %v450_v6 = vld [vmem:[#allocation7] sm:$0xff]   ;;  %v451_v7 = vld [vmem:[#allocation7 + $0x8] sm:$0xff]   ;;  %s530_s8 = scalar_lea.vmem %s340_s7, 384  ;;  %p535_p11 = scmp.lt.s32.totalorder %s340_s7, %s340_s7 }
  0x39   :  { %394 = vmatprep.subr.bf16.mxu0 %v441_v1  ;;  %408 = vmatprep.mubr.bf16.mxu0 %v448_v4  ;;  %v445_v8 = vld [vmem:[#allocation5 + $0x28] sm:$0xff]   ;;  %v446_v9 = vld [vmem:[#allocation5 + $0x30] sm:$0xff]   ;;  %v447_v10 = vld [vmem:[#allocation5 + $0x38] sm:$0xff]   ;;  %p531_p10 = scmp.ne.s32.totalorder %s340_s7, %s530_s8  ;;  %p536_p12 = scmp.lt.s32.totalorder %s530_s8, %s530_s8 }
  0x3a   :  { %412 = vmatprep.subr.bf16.mxu1 %v450_v6  ;;  %v449_v11 = vld [vmem:[#allocation2 + $0x8] ss:$0 sps:$4 sm:$0xff]   ;;  %v452_v12 = vld [vmem:[#allocation7 + $0x10] sm:$0xff]   ;;  %v454_v14 = vld [vmem:[#allocation7 + $0x20] sm:$0xff]  }
  0x3b   :  { %413 = vmatpush3.bf16.msra.mxu1 %v450_v6  ;;  %v453_v13 = vld [vmem:[#allocation7 + $0x18] sm:$0xff]   ;;  %v455_v15 = vld [vmem:[#allocation7 + $0x28] sm:$0xff]   ;;  %v456_v16 = vld [vmem:[#allocation7 + $0x30] sm:$0xff]   ;;  %p537_p13 = por %p536_p12, %p535_p11 }
  0x3c   :  { %395 = vmatpush3.bf16.msra.mxu0 %v441_v1  ;;  %414 = vmatprep.subr.bf16.mxu1 %v451_v7  ;;  %v457_v17 = vld [vmem:[#allocation7 + $0x38] sm:$0xff]   ;;  %v352_v18 = vld [vmem:[%s668_s2] ss:$0 sm:$0xff] }
  0x3d   :  { %396 = vmatprep.subr.bf16.mxu0 %v442_v2  ;;  %v363_v43 = vld [vmem:[%s670_s4] ss:$0 sm:$0xff]  ;;  %p538_p0 = pnand %p537_p13, %p531_p10 }
  0x3f   :  { %415 = vmatpush3.bf16.msra.mxu1 %v451_v7 }
  0x40   :  { %397 = vmatpush3.bf16.msra.mxu0 %v442_v2  ;;  %416 = vmatprep.subr.bf16.mxu1 %v452_v12 }
  0x41   :  { %398 = vmatprep.subr.bf16.mxu0 %v443_v3 }
  0x43   :  { %417 = vmatpush3.bf16.msra.mxu1 %v452_v12 }
  0x44   :  { %399 = vmatpush3.bf16.msra.mxu0 %v443_v3  ;;  %418 = vmatprep.subr.bf16.mxu1 %v453_v13 }
  0x45   :  { %400 = vmatprep.subr.bf16.mxu0 %v444_v5 }
  0x47   :  { %419 = vmatpush3.bf16.msra.mxu1 %v453_v13 }
  0x48   :  { %401 = vmatpush3.bf16.msra.mxu0 %v444_v5  ;;  %420 = vmatprep.subr.bf16.mxu1 %v454_v14 }
  0x49   :  { %402 = vmatprep.subr.bf16.mxu0 %v445_v8 }
  0x4b   :  { %421 = vmatpush3.bf16.msra.mxu1 %v454_v14 }
  0x4c   :  { %403 = vmatpush3.bf16.msra.mxu0 %v445_v8  ;;  %422 = vmatprep.subr.bf16.mxu1 %v455_v15 }
  0x4d   :  { %404 = vmatprep.subr.bf16.mxu0 %v446_v9 }
  0x4f   :  { %423 = vmatpush3.bf16.msra.mxu1 %v455_v15 }
  0x50   :  { %405 = vmatpush3.bf16.msra.mxu0 %v446_v9  ;;  %424 = vmatprep.subr.bf16.mxu1 %v456_v16 }
  0x51   :  { %406 = vmatprep.subr.bf16.mxu0 %v447_v10 }
  0x53   :  { %425 = vmatpush3.bf16.msra.mxu1 %v456_v16 }
  0x54   :  { %407 = vmatpush3.bf16.msra.mxu0 %v447_v10  ;;  %426 = vmatprep.subr.bf16.mxu1 %v457_v17 }
  0x57   :  { %409 = vmatmul.mubr.bf16.vlgmr.msra.gmra.mrb[0].mxu0 %v449_v11  ;;  %427 = vmatpush3.bf16.msra.mxu1 %v457_v17 }
 0x12a   :  { %v410_v19 = vpop.f32.mrb[0].mxu0 }
 0x12b   :  { %v190_v20 = vadd.f32 %v410_v19, %v352_v18  ;;  %v181_v21 = vpop.f32.mrb[1].mxu0 }
 0x12c   :  { %v182_v22 = vadd.f32 %v352_v18, %v181_v21  ;;  %v411_v23 = vpop.f32.mrb[2].mxu0 }
 0x12d   :  { %v200_v24 = vmul.f32 0.70710677, %v190_v20  ;;  %v184_v25 = vpop.f32.mrb[3].mxu0  ;;  %v197_v34 = vmul.f32 0.5, %v190_v20 }
 0x12e   :  { %v198_v26 = vmul.f32 0.70710677, %v182_v22  ;;  %v185_v27 = vadd.f32 %v352_v18, %v184_v25  ;;  %v195_v35 = vmul.f32 0.5, %v182_v22 }
 0x12f   :  { %458 = verf.f32 %v200_v24 }
 0x130   :  { %460 = verf.f32 %v198_v26  ;;  %v199_v28 = vmul.f32 0.70710677, %v185_v27  ;;  %v196_v36 = vmul.f32 0.5, %v185_v27 }
 0x132   :  { %462 = verf.f32 %v199_v28 }
 0x139   :  { %v459_v29 = vpop.eup %458 }
 0x13a   :  { %v461_v30 = vpop.eup %460  ;;  %v206_v31 = vadd.f32 1.0, %v459_v29 }
 0x13b   :  { %v204_v32 = vadd.f32 1.0, %v461_v30 }
 0x13c   :  { %v463_v33 = vpop.eup %462  ;;  %v209_v38 = vmul.f32 %v206_v31, %v197_v34 }
 0x13d   :  { %v205_v37 = vadd.f32 1.0, %v463_v33  ;;  %v207_v39 = vmul.f32 %v204_v32, %v195_v35 }
 0x13e   :  { %v211_v42 = vpack.c.bf16 %v209_v38, %v209_v38 }
 0x13f   :  { %v208_v40 = vmul.f32 %v205_v37, %v196_v36 }
 0x141   :  { %v210_v41 = vpack.c.bf16 %v208_v40, %v207_v39 }
 0x143   :  { %428 = vmatprep.mubr.bf16.mxu1 %v210_v41 }
 0x144   :  { %429 = vmatmul.mubr.bf16.vlgmr.msra.gmra.mrb[0].mxu1 %v211_v42 }
 0x217   :  { %v430_v44 = vpop.f32.mrb[0].mxu1 }
 0x218   :  { %v326_v45 = vadd.f32 %v430_v44, %v363_v43  ;;  %v317_v46 = vpop.f32.mrb[1].mxu1 }
 0x219   :  { %v318_v47 = vadd.f32 %v363_v43, %v317_v46  ;;  %v431_v48 = vpop.f32.mrb[2].mxu1 }
 0x21a   :  { %333 = vst [vmem:[#allocation8 + $0x10] sm:$0xff] %v326_v45  ;;  %v320_v49 = vpop.f32.mrb[3].mxu1 }
 0x21b   :  { %331 = vst [vmem:[#allocation8] sm:$0xff] %v318_v47  ;;  %v321_v50 = vadd.f32 %v363_v43, %v320_v49 }
 0x21d   :  { %332 = vst [vmem:[#allocation8 + $0x8] sm:$0xff] %v321_v50 }
 0x21e   :  { %541 = shalt.err (!%p538_p0)
}
 0x21f   :  { %s542_s10 = scalar_lea.hbm %s671_s5, 384 }
 0x220   :  { %p543_p1 = scmp.ne.s32.totalorder %s671_s5, %s542_s10  ;;  %p546_p2 = scmp.lt.u32.totalorder %s542_s10, %s671_s5 }
 0x222   :  { %p548_p3 = pnand %p546_p2, %p543_p1 }
 0x224   :  { %551 = shalt.err (!%p548_p3)
}
 0x225   :  { %s564_s15 = smov 128   ;;  %s565_s16 = smov 8  }
 0x226   :  { %345 = dma.vmem_to_hbm [thread:$0]  %s340_s7, 384, %s671_s5, [#allocation4], %s564_s15, %s564_s15, %s565_s16  }
 0x227   :  { %556 = dma.done.wait [#allocation4], 384  }
 0x228   :  { %557 = vsyncadd [#allocation4], 4294966912 }
 0x229   :  { %349 = vsyncpa [#allocation3], 1 }
 0x22a   :  { %350 = vsyncpa [#allocation6], 1 }
 0x22b   :  { %351 = vsyncpa [#allocation4], 1 }

</bundles_post_ra>
